<compile_context>
chip_gen: v7x
topology: tpu7x:2x2x1
jax: 0.10.0
libtpu: 0.0.40
codegen_flags: <defaults>
</compile_context>

<pallas_src>
import jax
import jax.numpy as jnp
from jax.experimental import pallas as pl
from jax.experimental.pallas import tpu as pltpu


def _round_up(x, m):
    return ((x + m - 1) // m) * m


def ffn_kernel(x_ref, w1_ref, b1_ref, w2_ref, b2_ref, o_ref, acc_ref):
    """One (row-tile, d_ff-tile) step of relu(x@W1 + b1) @ W2 + b2."""
    f = pl.program_id(1)

    # Fold b2 into the accumulator init (removes a VPU add from the hot loop).
    @pl.when(f == 0)
    def _():
        acc_ref[...] = jnp.broadcast_to(
            b2_ref[...].astype(jnp.float32), acc_ref.shape)

    # First matmul + bias + ReLU over this d_ff tile. The hidden activation
    # stays in VMEM/vregs — it never touches HBM.
    h = jnp.dot(x_ref[...], w1_ref[...], preferred_element_type=jnp.float32)
    h = jnp.maximum(h + b1_ref[...].astype(jnp.float32), 0.0)

    # Second matmul: partial contribution of this d_ff tile, f32 accumulation.
    acc_ref[...] += jnp.dot(h.astype(w2_ref.dtype), w2_ref[...],
                            preferred_element_type=jnp.float32)

    @pl.when(f == pl.num_programs(1) - 1)
    def _():
        o_ref[...] = acc_ref[...].astype(o_ref.dtype)


def positionwise_feed_forward(x, w1, b1, w2, b2, *, tm=256, tf=512):
    """relu(x @ w1 + b1) @ w2 + b2, fused in one Pallas TPU kernel.

    x : (B, S, d_model)
    w1: (d_model, d_ff), b1: (d_ff,)
    w2: (d_ff, d_model), b2: (d_model,)
    (PyTorch nn.Linear stores (out, in); these are the transposed weights so
    the kernel computes x @ W, identical math.)
    """
    B, S, d_model = x.shape
    d_ff = w1.shape[1]
    M = B * S
    dtype = x.dtype

    # Lane-dense feature dims (multiples of 128) and sublane-aligned row tile.
    sub = 16 if dtype == jnp.bfloat16 else 8
    dmp = _round_up(d_model, 128)
    dfp = _round_up(d_ff, 128)
    tf = min(tf, dfp)
    dfp = _round_up(dfp, tf)                # d_ff tile must divide padded d_ff
    tm = min(tm, _round_up(M, sub))
    m_pad = _round_up(M, tm)

    # Zero padding keeps the math exact: padded hidden units see zero weights
    # and zero bias (relu(0)=0 contributes nothing), padded output columns and
    # padded rows are sliced away below.
    x2d = jnp.pad(x.reshape(M, d_model),
                  ((0, m_pad - M), (0, dmp - d_model)))
    w1p = jnp.pad(w1, ((0, dmp - d_model), (0, dfp - d_ff)))
    b1p = jnp.pad(b1, (0, dfp - d_ff)).reshape(1, dfp)
    w2p = jnp.pad(w2, ((0, dfp - d_ff), (0, dmp - d_model)))
    b2p = jnp.pad(b2, (0, dmp - d_model)).reshape(1, dmp)

    grid = (m_pad // tm, dfp // tf)

    itemsize = jnp.dtype(dtype).itemsize
    cost = pl.CostEstimate(
        flops=4 * M * d_model * d_ff,            # two matmuls
        transcendentals=0,
        bytes_accessed=itemsize * (2 * M * d_model      # x in + out
                                   + 2 * d_model * d_ff  # W1 + W2
                                   + d_ff + d_model),    # biases
    )

    out2d = pl.pallas_call(
        ffn_kernel,
        out_shape=jax.ShapeDtypeStruct((m_pad, dmp), dtype),
        grid_spec=pltpu.PrefetchScalarGridSpec(
            num_scalar_prefetch=0,
            grid=grid,
            in_specs=[
                pl.BlockSpec((tm, dmp), lambda i, f: (i, 0)),   # x row tile
                pl.BlockSpec((dmp, tf), lambda i, f: (0, f)),   # W1 d_ff tile
                pl.BlockSpec((1, tf), lambda i, f: (0, f)),     # b1 tile
                pl.BlockSpec((tf, dmp), lambda i, f: (f, 0)),   # W2 d_ff tile
                pl.BlockSpec((1, dmp), lambda i, f: (0, 0)),    # b2 (invariant)
            ],
            out_specs=pl.BlockSpec((tm, dmp), lambda i, f: (i, 0)),
            scratch_shapes=[pltpu.VMEM((tm, dmp), jnp.float32)],  # accumulator
        ),
        compiler_params=pltpu.CompilerParams(
            dimension_semantics=("parallel", "arbitrary"),
            vmem_limit_bytes=48 * 1024 * 1024,
        ),
        cost_estimate=cost,
    )(x2d, w1p, b1p, w2p, b2p)

    return out2d[:M, :d_model].reshape(B, S, d_model)


if __name__ == "__main__":
    # Small shapes consistent with the module: d_model=32, d_ff=64.
    B, S, d_model, d_ff = 2, 8, 32, 64

    key = jax.random.PRNGKey(0)
    kx, kw1, kb1, kw2, kb2 = jax.random.split(key, 5)

    x = jax.random.normal(kx, (B, S, d_model), dtype=jnp.float32)

    # Deterministic parameter init (uniform, like nn.Linear's 1/sqrt(fan_in)).
    lim1 = 1.0 / d_model ** 0.5
    lim2 = 1.0 / d_ff ** 0.5
    w1 = jax.random.uniform(kw1, (d_model, d_ff), jnp.float32, -lim1, lim1)
    b1 = jax.random.uniform(kb1, (d_ff,), jnp.float32, -lim1, lim1)
    w2 = jax.random.uniform(kw2, (d_ff, d_model), jnp.float32, -lim2, lim2)
    b2 = jax.random.uniform(kb2, (d_model,), jnp.float32, -lim2, lim2)

    out = positionwise_feed_forward(x, w1, b1, w2, b2)
    out = jax.block_until_ready(out)

    # Pure-JAX reference check of the forward semantics.
    ref = jnp.maximum(x @ w1 + b1, 0.0) @ w2 + b2
    assert out.shape == (B, S, d_model)
    assert jnp.allclose(out, ref, atol=1e-5, rtol=1e-5), \
        float(jnp.max(jnp.abs(out - ref)))

    print("KERNEL_OK")
</pallas_src>

<mosaic_0001>
module attributes {stable_mosaic.version = 11 : i64} {
  func.func @ffn_kernel(%arg0: i32, %arg1: i32, %arg2: memref<16x128xf32, #tpu.memory_space<vmem>>, %arg3: memref<128x128xf32, #tpu.memory_space<vmem>>, %arg4: memref<1x128xf32, #tpu.memory_space<vmem>>, %arg5: memref<128x128xf32, #tpu.memory_space<vmem>>, %arg6: memref<1x128xf32, #tpu.memory_space<vmem>>, %arg7: memref<16x128xf32, #tpu.memory_space<vmem>>, %arg8: memref<16x128xf32, #tpu.memory_space<vmem>>) attributes {dimension_semantics = [#tpu.dimension_semantics<parallel>, #tpu.dimension_semantics<arbitrary>], iteration_bounds = array<i64: 1, 1>, scalar_prefetch = 0 : i64, scratch_operands = 1 : i64, tpu.core_type = #tpu.core_type<tc>, window_params = [{transform_indices = @transform_0, window_bounds = array<i64: 16, 128>}, {transform_indices = @transform_1, window_bounds = array<i64: 128, 128>}, {transform_indices = @transform_2, window_bounds = array<i64: 1, 128>}, {transform_indices = @transform_3, window_bounds = array<i64: 128, 128>}, {pipeline_mode = #tpu.pipeline_mode<synchronous>, transform_indices = @transform_4, window_bounds = array<i64: 1, 128>}, {transform_indices = @transform_5, window_bounds = array<i64: 16, 128>}]} {
    %c0_i32 = arith.constant 0 : i32
    %0 = arith.cmpi eq, %arg1, %c0_i32 : i32
    %1 = arith.extui %0 : i1 to i32
    %c0_i32_0 = arith.constant 0 : i32
    %2 = arith.cmpi ne, %1, %c0_i32_0 : i32
    scf.if %2 {
      %c0_16 = arith.constant 0 : index
      %c0_17 = arith.constant 0 : index
      %19 = vector.load %arg6[%c0_16, %c0_17] : memref<1x128xf32, #tpu.memory_space<vmem>>, vector<1x128xf32>
      %20 = vector.shape_cast %19 : vector<1x128xf32> to vector<1x128xf32>
      %21 = vector.broadcast %20 : vector<1x128xf32> to vector<16x128xf32>
      %c0_18 = arith.constant 0 : index
      %c0_19 = arith.constant 0 : index
      %22 = vector.load %arg8[%c0_18, %c0_19] : memref<16x128xf32, #tpu.memory_space<vmem>>, vector<16x128xf32>
      tpu.vector_store %arg8[%c0_18, %c0_19], %21 {strides = array<i32>} : memref<16x128xf32, #tpu.memory_space<vmem>>, vector<16x128xf32>,
    } else {
    }
    %c0 = arith.constant 0 : index
    %c0_1 = arith.constant 0 : index
    %3 = vector.load %arg2[%c0, %c0_1] : memref<16x128xf32, #tpu.memory_space<vmem>>, vector<16x128xf32>
    %c0_2 = arith.constant 0 : index
    %c0_3 = arith.constant 0 : index
    %4 = vector.load %arg3[%c0_2, %c0_3] : memref<128x128xf32, #tpu.memory_space<vmem>>, vector<128x128xf32>
    %cst = arith.constant dense<0.000000e+00> : vector<16x128xf32>
    %5 = tpu.matmul %3, %4, %cst {dimension_numbers = #tpu.dot_dimension_numbers<[1], [0], [0], [1], [0, 0, 1, 1], [], []>} : vector<16x128xf32>, vector<128x128xf32>, vector<16x128xf32> -> vector<16x128xf32>
    %c0_4 = arith.constant 0 : index
    %c0_5 = arith.constant 0 : index
    %6 = vector.load %arg4[%c0_4, %c0_5] : memref<1x128xf32, #tpu.memory_space<vmem>>, vector<1x128xf32>
    %7 = vector.broadcast %6 : vector<1x128xf32> to vector<16x128xf32>
    %8 = arith.addf %5, %7 : vector<16x128xf32>
    %cst_6 = arith.constant 0.000000e+00 : f32
    %9 = vector.broadcast %cst_6 : f32 to vector<16x128xf32>
    %10 = arith.maximumf %8, %9 : vector<16x128xf32>
    %c0_7 = arith.constant 0 : index
    %c0_8 = arith.constant 0 : index
    %11 = vector.load %arg8[%c0_7, %c0_8] : memref<16x128xf32, #tpu.memory_space<vmem>>, vector<16x128xf32>
    %c0_9 = arith.constant 0 : index
    %c0_10 = arith.constant 0 : index
    %12 = vector.load %arg5[%c0_9, %c0_10] : memref<128x128xf32, #tpu.memory_space<vmem>>, vector<128x128xf32>
    %cst_11 = arith.constant dense<0.000000e+00> : vector<16x128xf32>
    %13 = tpu.matmul %10, %12, %cst_11 {dimension_numbers = #tpu.dot_dimension_numbers<[1], [0], [0], [1], [0, 0, 1, 1], [], []>} : vector<16x128xf32>, vector<128x128xf32>, vector<16x128xf32> -> vector<16x128xf32>
    %14 = arith.addf %11, %13 : vector<16x128xf32>
    %c0_12 = arith.constant 0 : index
    %c0_13 = arith.constant 0 : index
    %15 = vector.load %arg8[%c0_12, %c0_13] : memref<16x128xf32, #tpu.memory_space<vmem>>, vector<16x128xf32>
    tpu.vector_store %arg8[%c0_12, %c0_13], %14 {strides = array<i32>} : memref<16x128xf32, #tpu.memory_space<vmem>>, vector<16x128xf32>,
    %c0_i32_14 = arith.constant 0 : i32
    %16 = arith.cmpi eq, %arg1, %c0_i32_14 : i32
    %17 = arith.extui %16 : i1 to i32
    %c0_i32_15 = arith.constant 0 : i32
    %18 = arith.cmpi ne, %17, %c0_i32_15 : i32
    scf.if %18 {
      %c0_16 = arith.constant 0 : index
      %c0_17 = arith.constant 0 : index
      %19 = vector.load %arg8[%c0_16, %c0_17] : memref<16x128xf32, #tpu.memory_space<vmem>>, vector<16x128xf32>
      %c0_18 = arith.constant 0 : index
      %c0_19 = arith.constant 0 : index
      %20 = vector.load %arg7[%c0_18, %c0_19] : memref<16x128xf32, #tpu.memory_space<vmem>>, vector<16x128xf32>
      tpu.vector_store %arg7[%c0_18, %c0_19], %19 {strides = array<i32>} : memref<16x128xf32, #tpu.memory_space<vmem>>, vector<16x128xf32>,
    } else {
    }
    return
  }
  func.func @transform_0(%arg0: i32, %arg1: i32) -> (i32, i32) {
    %c0_i32 = arith.constant 0 : i32
    %c0_i32_0 = arith.constant 0 : i32
    return %arg0, %c0_i32 : i32, i32
  }
  func.func @transform_1(%arg0: i32, %arg1: i32) -> (i32, i32) {
    %c0_i32 = arith.constant 0 : i32
    %c0_i32_0 = arith.constant 0 : i32
    return %c0_i32, %arg1 : i32, i32
  }
  func.func @transform_2(%arg0: i32, %arg1: i32) -> (i32, i32) {
    %c0_i32 = arith.constant 0 : i32
    %c0_i32_0 = arith.constant 0 : i32
    return %c0_i32, %arg1 : i32, i32
  }
  func.func @transform_3(%arg0: i32, %arg1: i32) -> (i32, i32) {
    %c0_i32 = arith.constant 0 : i32
    %c0_i32_0 = arith.constant 0 : i32
    return %arg1, %c0_i32 : i32, i32
  }
  func.func @transform_4(%arg0: i32, %arg1: i32) -> (i32, i32) {
    %c0_i32 = arith.constant 0 : i32
    %c0_i32_0 = arith.constant 0 : i32
    %c0_i32_1 = arith.constant 0 : i32
    return %c0_i32, %c0_i32_0 : i32, i32
  }
  func.func @transform_5(%arg0: i32, %arg1: i32) -> (i32, i32) {
    %c0_i32 = arith.constant 0 : i32
    %c0_i32_0 = arith.constant 0 : i32
    return %arg0, %c0_i32 : i32, i32
  }
}

</mosaic_0001>

<bundles_post_ra>
// kernel: tpu_custom_call.1
= control target key start
LH: loop header
LB: loop body
LE: loop exit
PB: predicated region body
PF: predicated region fallthrough
CT: control target
= control target key end

     0   :  { %10 = vsyncpa [#allocation4], 0  ;;  %s680_s0 = inlined_call_operand.hbm [shape: f32[16,128], index: 0, kind: input, shape index: {}]   ;;  %s681_s1 = inlined_call_operand.hbm [shape: f32[128,128], index: 1, kind: input, shape index: {}]   ;;  %s682_s2 = inlined_call_operand.vmem [shape: f32[1,128], index: 2, kind: input, shape index: {}]   ;;  %s683_s3 = inlined_call_operand.hbm [shape: f32[128,128], index: 3, kind: input, shape index: {}]   ;;  %s684_s4 = inlined_call_operand.vmem [shape: f32[1,128], index: 4, kind: input, shape index: {}]   ;;  %s685_s5 = inlined_call_operand.hbm [shape: f32[16,128], index: 5, kind: output, shape index: {}]  }
   0x1   :  { %11 = vsyncpa [#allocation7], 0 }
   0x2   :  { %12 = vsyncpa [#allocation5], 0  ;;  %s571_s18 = smov [#allocation6]   ;;  %s572_s20 = smov [#allocation3]  }
   0x3   :  { %s30_s19 = sshll.u32 %s571_s18, 4  ;;  %s18_s21 = sshll.u32 %s572_s20, 4  ;;  %s31_s19 = int_to_ptr.vmem [resolvable:$true] %s30_s19  ;;  %s607_s21 = int_to_ptr.vmem [resolvable:$true] %s18_s21 }
   0x4   :  { %s477_s24 = scalar_lea.hbm %s681_s1, 2048 }
   0x5   :  { %p478_p0 = scmp.ne.s32.totalorder %s681_s1, %s477_s24  ;;  %p481_p1 = scmp.lt.u32.totalorder %s477_s24, %s681_s1 }
   0x7   :  { %p483_p2 = pnand %p481_p1, %p478_p0 }
   0x9   :  { %486 = shalt.err (!%p483_p2)
}
   0xa   :  { %s487_s29 = scalar_lea.vmem %s31_s19, 2048  ;;  %p492_p4 = scmp.lt.s32.totalorder %s31_s19, %s31_s19 }
   0xb   :  { %p488_p3 = scmp.ne.s32.totalorder %s31_s19, %s487_s29  ;;  %p493_p5 = scmp.lt.s32.totalorder %s487_s29, %s487_s29 }
   0xd   :  { %p494_p6 = por %p493_p5, %p492_p4 }
   0xf   :  { %p495_p7 = pnand %p494_p6, %p488_p3 }
  0x11   :  { %498 = shalt.err (!%p495_p7)
}
  0x12   :  { %s573_s30 = smov 128   ;;  %s574_s6 = smov 8  }
  0x13   :  { %36 = dma.hbm_to_vmem [thread:$0]  %s681_s1, 2048, %s31_s19, [#allocation7], %s573_s30, %s573_s30, %s574_s6  }
  0x14   :  { %s499_s11 = scalar_lea.hbm %s680_s0, 256 }
  0x15   :  { %p500_p8 = scmp.ne.s32.totalorder %s680_s0, %s499_s11  ;;  %p503_p9 = scmp.lt.u32.totalorder %s499_s11, %s680_s0 }
  0x17   :  { %p505_p10 = pnand %p503_p9, %p500_p8 }
  0x19   :  { %508 = shalt.err (!%p505_p10)
}
  0x1a   :  { %s509_s16 = scalar_lea.vmem %s607_s21, 256  ;;  %p514_p12 = scmp.lt.s32.totalorder %s607_s21, %s607_s21 }
  0x1b   :  { %p510_p11 = scmp.ne.s32.totalorder %s607_s21, %s509_s16  ;;  %p515_p13 = scmp.lt.s32.totalorder %s509_s16, %s509_s16 }
  0x1d   :  { %p516_p0 = por %p515_p13, %p514_p12 }
  0x1f   :  { %p517_p1 = pnand %p516_p0, %p510_p11 }
  0x21   :  { %520 = shalt.err (!%p517_p1)
}
  0x22   :  { %24 = dma.hbm_to_vmem [thread:$0]  %s680_s0, 256, %s607_s21, [#allocation4], %s573_s30, %s573_s30, %s574_s6  }
  0x23   :  { %s575_s18 = smov [#allocation8]   ;;  %s521_s23 = scalar_lea.hbm %s683_s3, 2048 }
  0x24   :  { %s44_s19 = sshll.u32 %s575_s18, 4  ;;  %p522_p2 = scmp.ne.s32.totalorder %s683_s3, %s521_s23  ;;  %s45_s19 = int_to_ptr.vmem [resolvable:$true] %s44_s19 }
  0x25   :  { %p525_p3 = scmp.lt.u32.totalorder %s521_s23, %s683_s3 }
  0x27   :  { %p527_p4 = pnand %p525_p3, %p522_p2 }
  0x29   :  { %530 = shalt.err (!%p527_p4)
}
  0x2a   :  { %s531_s28 = scalar_lea.vmem %s45_s19, 2048  ;;  %p536_p6 = scmp.lt.s32.totalorder %s45_s19, %s45_s19 }
  0x2b   :  { %p532_p5 = scmp.ne.s32.totalorder %s45_s19, %s531_s28  ;;  %p537_p7 = scmp.lt.s32.totalorder %s531_s28, %s531_s28 }
  0x2d   :  { %p538_p8 = por %p537_p7, %p536_p6 }
  0x2f   :  { %p539_p9 = pnand %p538_p8, %p532_p5 }
  0x31   :  { %542 = shalt.err (!%p539_p9)
}
  0x32   :  { %50 = dma.hbm_to_vmem [thread:$0]  %s683_s3, 2048, %s45_s19, [#allocation7], %s573_s30, %s573_s30, %s574_s6  }
  0x33   :  { %565 = dma.done.wait [#allocation4], 256  }
  0x34   :  { %566 = vsyncadd [#allocation4], 4294967040 }
  0x35   :  { %567 = dma.done.wait [#allocation7], 4096  }
  0x36   :  { %568 = vsyncadd [#allocation7], 4294963200  ;;  %v77_v0 = vld [vmem:[#allocation6] sm:$0xff]  ;;  %v78_v1 = vld [vmem:[#allocation6 + $0x8] sm:$0xff]  ;;  %s576_s9 = smov [#allocation9]  }
  0x37   :  { %v79_v2 = vld [vmem:[#allocation6 + $0x10] sm:$0xff]  ;;  %v407_v3 = vpack.c.bf16 %v78_v1, %v77_v0  ;;  %v80_v4 = vld [vmem:[#allocation6 + $0x18] sm:$0xff]  ;;  %v81_v6 = vld [vmem:[#allocation6 + $0x20] sm:$0xff]  ;;  %s286_s10 = sshll.u32 %s576_s9, 4  ;;  %s287_s10 = int_to_ptr.vmem [resolvable:$true] %s286_s10 }
  0x38   :  { %v411_v5 = vpack.c.bf16 %v80_v4, %v79_v2  ;;  %v82_v7 = vld [vmem:[#allocation6 + $0x28] sm:$0xff]  ;;  %v83_v9 = vld [vmem:[#allocation6 + $0x30] sm:$0xff]  ;;  %v84_v10 = vld [vmem:[#allocation6 + $0x38] sm:$0xff]  ;;  %p548_p11 = scmp.lt.s32.totalorder %s287_s10, %s287_s10 }
  0x39   :  { %408 = vmatprep.subr.bf16.mxu0 %v407_v3  ;;  %v415_v8 = vpack.c.bf16 %v82_v7, %v81_v6  ;;  %v75_v11 = vld [vmem:[#allocation3] sm:$0xff]  ;;  %v179_v12 = vld [vmem:[#allocation8] sm:$0xff]  ;;  %v180_v13 = vld [vmem:[#allocation8 + $0x8] sm:$0xff]  ;;  %v419_v20 = vpack.c.bf16 %v84_v10, %v83_v9 }
  0x3a   :  { %410 = vmatpush3.bf16.msra.mxu0 %v407_v3  ;;  %369 = vmatprep.mubr.f32.mxu0 %v75_v11  ;;  %v181_v14 = vld [vmem:[#allocation8 + $0x10] sm:$0xff]  ;;  %v439_v15 = vpack.c.bf16 %v180_v13, %v179_v12  ;;  %v182_v16 = vld [vmem:[#allocation8 + $0x18] sm:$0xff]  ;;  %v183_v18 = vld [vmem:[#allocation8 + $0x20] sm:$0xff] }
  0x3b   :  { %412 = vmatprep.subr.bf16.mxu0 %v411_v5  ;;  %v443_v17 = vpack.c.bf16 %v182_v16, %v181_v14  ;;  %v184_v19 = vld [vmem:[#allocation8 + $0x28] sm:$0xff]  ;;  %v85_v21 = vld [vmem:[#allocation6 + $0x40] sm:$0xff]  ;;  %v185_v24 = vld [vmem:[#allocation8 + $0x30] sm:$0xff] }
  0x3c   :  { %440 = vmatprep.subr.bf16.mxu1 %v439_v15  ;;  %v86_v22 = vld [vmem:[#allocation6 + $0x48] sm:$0xff]  ;;  %v447_v23 = vpack.c.bf16 %v184_v19, %v183_v18  ;;  %v186_v25 = vld [vmem:[#allocation8 + $0x38] sm:$0xff]  ;;  %v87_v27 = vld [vmem:[#allocation6 + $0x50] sm:$0xff] }
  0x3d   :  { %442 = vmatpush3.bf16.msra.mxu1 %v439_v15  ;;  %v423_v26 = vpack.c.bf16 %v86_v22, %v85_v21  ;;  %v88_v28 = vld [vmem:[#allocation6 + $0x58] sm:$0xff]  ;;  %v451_v29 = vpack.c.bf16 %v186_v25, %v185_v24  ;;  %v187_v30 = vld [vmem:[#allocation8 + $0x40] sm:$0xff]  ;;  %v188_v31 = vld [vmem:[#allocation8 + $0x48] sm:$0xff] }
  0x3e   :  { %414 = vmatpush3.bf16.msra.mxu0 %v411_v5  ;;  %444 = vmatprep.subr.bf16.mxu1 %v443_v17  ;;  %v427_v32 = vpack.c.bf16 %v88_v28, %v87_v27  ;;  %v89_v33 = vld [vmem:[#allocation6 + $0x60] sm:$0xff]  ;;  %v90_v34 = vld [vmem:[#allocation6 + $0x68] sm:$0xff]  ;;  %v455_v35 = vpack.c.bf16 %v188_v31, %v187_v30  ;;  %v189_v36 = vld [vmem:[#allocation8 + $0x50] sm:$0xff] }
  0x3f   :  { %416 = vmatprep.subr.bf16.mxu0 %v415_v8  ;;  %v190_v37 = vld [vmem:[#allocation8 + $0x58] sm:$0xff]  ;;  %v431_v38 = vpack.c.bf16 %v90_v34, %v89_v33  ;;  %v91_v39 = vld [vmem:[#allocation6 + $0x70] sm:$0xff]  ;;  %v191_v42 = vld [vmem:[#allocation8 + $0x60] sm:$0xff] }
  0x40   :  { %v92_v40 = vld [vmem:[#allocation6 + $0x78] sm:$0xff]  ;;  %v459_v41 = vpack.c.bf16 %v190_v37, %v189_v36  ;;  %v192_v43 = vld [vmem:[#allocation8 + $0x68] sm:$0xff]  ;;  %v193_v47 = vld [vmem:[#allocation8 + $0x70] sm:$0xff] }
  0x41   :  { %446 = vmatpush3.bf16.msra.mxu1 %v443_v17  ;;  %v435_v44 = vpack.c.bf16 %v92_v40, %v91_v39  ;;  %v463_v45 = vpack.c.bf16 %v192_v43, %v191_v42  ;;  %v76_v46 = vld [vmem:[#allocation3 + $0x8] sm:$0xff]  ;;  %v300_v50 = vld [vmem:[%s682_s2] ss:$0 sm:$0xff]  ;;  %s543_s2 = scalar_lea.vmem %s287_s10, 256 }
  0x42   :  { %418 = vmatpush3.bf16.msra.mxu0 %v415_v8  ;;  %448 = vmatprep.subr.bf16.mxu1 %v447_v23  ;;  %v194_v48 = vld [vmem:[#allocation8 + $0x78] sm:$0xff]  ;;  %v299_v57 = vld [vmem:[%s684_s4] ss:$0 sm:$0xff]  ;;  %p544_p10 = scmp.ne.s32.totalorder %s287_s10, %s543_s2  ;;  %p549_p12 = scmp.lt.s32.totalorder %s543_s2, %s543_s2 }
  0x43   :  { %420 = vmatprep.subr.bf16.mxu0 %v419_v20  ;;  %v467_v49 = vpack.c.bf16 %v194_v48, %v193_v47 }
  0x44   :  { %p550_p13 = por %p549_p12, %p548_p11 }
  0x45   :  { %450 = vmatpush3.bf16.msra.mxu1 %v447_v23 }
  0x46   :  { %422 = vmatpush3.bf16.msra.mxu0 %v419_v20  ;;  %452 = vmatprep.subr.bf16.mxu1 %v451_v29  ;;  %p551_p0 = pnand %p550_p13, %p544_p10 }
  0x47   :  { %424 = vmatprep.subr.bf16.mxu0 %v423_v26 }
  0x49   :  { %454 = vmatpush3.bf16.msra.mxu1 %v451_v29 }
  0x4a   :  { %426 = vmatpush3.bf16.msra.mxu0 %v423_v26  ;;  %456 = vmatprep.subr.bf16.mxu1 %v455_v35 }
  0x4b   :  { %428 = vmatprep.subr.bf16.mxu0 %v427_v32 }
  0x4d   :  { %458 = vmatpush3.bf16.msra.mxu1 %v455_v35 }
  0x4e   :  { %430 = vmatpush3.bf16.msra.mxu0 %v427_v32  ;;  %460 = vmatprep.subr.bf16.mxu1 %v459_v41 }
  0x4f   :  { %432 = vmatprep.subr.bf16.mxu0 %v431_v38 }
  0x51   :  { %462 = vmatpush3.bf16.msra.mxu1 %v459_v41 }
  0x52   :  { %434 = vmatpush3.bf16.msra.mxu0 %v431_v38  ;;  %464 = vmatprep.subr.bf16.mxu1 %v463_v45 }
  0x53   :  { %436 = vmatprep.subr.bf16.mxu0 %v435_v44 }
  0x55   :  { %466 = vmatpush3.bf16.msra.mxu1 %v463_v45 }
  0x56   :  { %438 = vmatpush3.bf16.msra.mxu0 %v435_v44  ;;  %468 = vmatprep.subr.bf16.mxu1 %v467_v49 }
  0x59   :  { %370 = vmatmul.mubr.f32.vlgmr.msra.gmra.mrb[0].mxu0 %v76_v46  ;;  %470 = vmatpush3.bf16.msra.mxu1 %v467_v49 }
 0x12c   :  { %v371_v51 = vpop.f32.mrb[0].mxu0 }
 0x12d   :  { %v172_v52 = vadd.f32 %v371_v51, %v300_v50  ;;  %v166_v53 = vpop.f32.mrb[1].mxu0 }
 0x12e   :  { %v167_v54 = vadd.f32 %v300_v50, %v166_v53 }
 0x12f   :  { %v176_v56 = vmax.f32 %v172_v52, 0.0 }
 0x130   :  { %v175_v55 = vmax.f32 %v167_v54, 0.0 }
 0x132   :  { %404 = vmatprep.mubr.f32.mxu1 %v175_v55 }
 0x133   :  { %405 = vmatmul.mubr.f32.vlgmr.msra.gmra.mrb[0].mxu1 %v176_v56 }
 0x206   :  { %v406_v58 = vpop.f32.mrb[0].mxu1 }
 0x207   :  { %v271_v59 = vadd.f32 %v406_v58, %v299_v57  ;;  %v261_v60 = vpop.f32.mrb[1].mxu1 }
 0x208   :  { %v270_v61 = vadd.f32 %v299_v57, %v261_v60 }
 0x209   :  { %280 = vst [vmem:[#allocation9 + $0x8] sm:$0xff] %v271_v59 }
 0x20a   :  { %279 = vst [vmem:[#allocation9] sm:$0xff] %v270_v61 }
 0x20b   :  { %554 = shalt.err (!%p551_p0)
}
 0x20c   :  { %s555_s4 = scalar_lea.hbm %s685_s5, 256 }
 0x20d   :  { %p556_p1 = scmp.ne.s32.totalorder %s685_s5, %s555_s4  ;;  %p559_p2 = scmp.lt.u32.totalorder %s555_s4, %s685_s5 }
 0x20f   :  { %p561_p3 = pnand %p559_p2, %p556_p1 }
 0x211   :  { %564 = shalt.err (!%p561_p3)
}
 0x212   :  { %292 = dma.vmem_to_hbm [thread:$0]  %s287_s10, 256, %s685_s5, [#allocation5], %s573_s30, %s573_s30, %s574_s6  }
 0x213   :  { %569 = dma.done.wait [#allocation5], 256  }
 0x214   :  { %570 = vsyncadd [#allocation5], 4294967040 }
 0x215   :  { %296 = vsyncpa [#allocation4], 1 }
 0x216   :  { %297 = vsyncpa [#allocation7], 1 }
 0x217   :  { %298 = vsyncpa [#allocation5], 1 }

</bundles_post_ra>
